<compile_context>
chip_gen: v6e
topology: v6e:2x2x1
jax: 0.10.0
libtpu: 0.0.40
codegen_flags: <defaults>
</compile_context>

<pallas_src>
import functools
import math

import jax
import jax.numpy as jnp
from jax.experimental import pallas as pl
from jax.experimental.pallas import tpu as pltpu


def _round_up(x: int, m: int) -> int:
    return (x + m - 1) // m * m


# ----------------------------------------------------------------------------
# Kernels
# ----------------------------------------------------------------------------
def _linear_fused_kernel(x_ref, w_ref, b_ref, o_ref):
    """Whole reduction dim resident: out = x @ W + b in one shot."""
    o_ref[...] = (jnp.dot(x_ref[...], w_ref[...],
                          preferred_element_type=jnp.float32)
                  + b_ref[...]).astype(o_ref.dtype)


def _linear_ktiled_kernel(x_ref, w_ref, b_ref, o_ref, acc_ref):
    """Large-vocab fallback: K-tiled reduction into a VMEM f32 accumulator."""
    k = pl.program_id(1)

    @pl.when(k == 0)
    def _():
        acc_ref[...] = jnp.zeros_like(acc_ref)

    acc_ref[...] += jnp.dot(x_ref[...], w_ref[...],
                            preferred_element_type=jnp.float32)

    @pl.when(k == pl.num_programs(1) - 1)
    def _():
        o_ref[...] = (acc_ref[...] + b_ref[...]).astype(o_ref.dtype)


# ----------------------------------------------------------------------------
# One-time parameter packing (init time, NOT in the forward path)
# ----------------------------------------------------------------------------
def prepare_params(w, b):
    """Transpose W to (F, O) and zero-pad to lane/sublane aligned (F_pad, O_pad);
    pad bias to (1, O_pad).  Done once so the forward pass does zero
    parameter-side work per call."""
    w = jnp.asarray(w, jnp.float32)
    b = jnp.asarray(b, jnp.float32)
    O, F = w.shape
    F_pad = _round_up(F, 128)     # reduction dim: x's lane axis / W's sublane axis
    O_pad = _round_up(O, 128)     # lane-dense output => unmasked stores
    w_p = jnp.zeros((F_pad, O_pad), jnp.float32).at[:F, :O].set(w.T)
    b_p = jnp.zeros((1, O_pad), jnp.float32).at[0, :O].set(b)
    return w_p, b_p


# ----------------------------------------------------------------------------
# Forward:  bow_vec (B, F)  ->  logits (B, output_size)
# ----------------------------------------------------------------------------
@functools.partial(jax.jit, static_argnames=("output_size",))
def bownn_forward(bow_vec, w_p, b_p, *, output_size):
    bow_vec = jnp.asarray(bow_vec, jnp.float32)
    B, F = bow_vec.shape
    F_pad, O_pad = w_p.shape

    # ---- batch tiling -------------------------------------------------------
    if B <= 512:
        # One full-array batch block (full array dims are exempt from the
        # (8,128) divisibility rule) -> no batch padding at all.
        B_pad, tm = B, B
    else:
        B_pad = _round_up(B, 8)
        tm = next(t for t in (512, 256, 128, 64, 32, 16, 8) if B_pad % t == 0)

    # ---- pad x only if needed (reduction dim must match the pre-padded W) ---
    x = bow_vec
    if (B_pad, F_pad) != (B, F):
        x = jnp.zeros((B_pad, F_pad), jnp.float32).at[:B, :F].set(bow_vec)

    # Single-pass (resident-W) path whenever W and the double-buffered x tile
    # comfortably fit the 32 MiB VMEM budget (always true for BoW vocabs).
    single_pass = (F_pad * O_pad * 4 <= 4 * 1024 * 1024 and
                   2 * tm * F_pad * 4 <= 16 * 1024 * 1024)

    cp = pltpu.CompilerParams(
        dimension_semantics=("parallel",) if single_pass
        else ("parallel", "arbitrary"),
        vmem_limit_bytes=32 * 1024 * 1024,
    )

    if single_pass:
        out_p = pl.pallas_call(
            _linear_fused_kernel,
            out_shape=jax.ShapeDtypeStruct((B_pad, O_pad), jnp.float32),
            grid_spec=pltpu.PrefetchScalarGridSpec(
                num_scalar_prefetch=0,
                grid=(B_pad // tm,),
                in_specs=[
                    # x tiles stream over the batch
                    pl.BlockSpec((tm, F_pad), lambda i: (i, 0)),
                    # constant block index => W DMA'd once, resident in VMEM
                    pl.BlockSpec((F_pad, O_pad), lambda i: (0, 0)),
                    # bias resident
                    pl.BlockSpec((1, O_pad), lambda i: (0, 0)),
                ],
                out_specs=pl.BlockSpec((tm, O_pad), lambda i: (i, 0)),
            ),
            compiler_params=cp,
        )(x, w_p, b_p)
    else:
        # Large-vocab fallback: tile the reduction dim (F_pad is a multiple of
        # 128, so gcd with 2048 gives a valid, as-large-as-possible K tile).
        tk = math.gcd(F_pad, 2048)
        out_p = pl.pallas_call(
            _linear_ktiled_kernel,
            out_shape=jax.ShapeDtypeStruct((B_pad, O_pad), jnp.float32),
            grid_spec=pltpu.PrefetchScalarGridSpec(
                num_scalar_prefetch=0,
                grid=(B_pad // tm, F_pad // tk),
                in_specs=[
                    pl.BlockSpec((tm, tk), lambda i, k: (i, k)),
                    pl.BlockSpec((tk, O_pad), lambda i, k: (k, 0)),
                    pl.BlockSpec((1, O_pad), lambda i, k: (0, 0)),
                ],
                out_specs=pl.BlockSpec((tm, O_pad), lambda i, k: (i, 0)),
                scratch_shapes=[pltpu.VMEM((tm, O_pad), jnp.float32)],
            ),
            compiler_params=cp,
        )(x, w_p, b_p)

    return out_p[:B, :output_size]


# ----------------------------------------------------------------------------
# Parameter init (PyTorch nn.Linear default: uniform(-1/sqrt(F), 1/sqrt(F)))
# ----------------------------------------------------------------------------
def init_params(key, input_size, output_size):
    kw, kb = jax.random.split(key)
    s = 1.0 / jnp.sqrt(jnp.float32(input_size))
    w = jax.random.uniform(kw, (output_size, input_size), jnp.float32, -s, s)
    b = jax.random.uniform(kb, (output_size,), jnp.float32, -s, s)
    return w, b


if __name__ == "__main__":
    INPUT_SIZE = 200   # bag-of-words vocabulary size
    OUTPUT_SIZE = 5    # number of classes
    BATCH = 4

    key = jax.random.PRNGKey(0)
    k_params, k_data = jax.random.split(key)
    w, b = init_params(k_params, INPUT_SIZE, OUTPUT_SIZE)
    w_p, b_p = prepare_params(w, b)          # init-time packing (once)

    # bag-of-words count vectors (non-negative integer counts as floats)
    bow_vec = jax.random.randint(
        k_data, (BATCH, INPUT_SIZE), 0, 4, dtype=jnp.int32).astype(jnp.float32)

    logits = bownn_forward(bow_vec, w_p, b_p, output_size=OUTPUT_SIZE)
    logits = jax.block_until_ready(logits)

    assert logits.shape == (BATCH, OUTPUT_SIZE), logits.shape
    ref = bow_vec @ w.T + b
    assert jnp.allclose(logits, ref, atol=1e-4, rtol=1e-4), (
        float(jnp.max(jnp.abs(logits - ref))))
    print("KERNEL_OK")
</pallas_src>

<mosaic_0001>
module attributes {stable_mosaic.version = 11 : i64} {
  func.func @_linear_fused_kernel(%arg0: i32, %arg1: memref<4x256xf32, #tpu.memory_space<vmem>>, %arg2: memref<256x128xf32, #tpu.memory_space<vmem>>, %arg3: memref<1x128xf32, #tpu.memory_space<vmem>>, %arg4: memref<4x128xf32, #tpu.memory_space<vmem>>) attributes {dimension_semantics = [#tpu.dimension_semantics<parallel>], iteration_bounds = array<i64: 1>, scalar_prefetch = 0 : i64, scratch_operands = 0 : i64, tpu.core_type = #tpu.core_type<tc>, window_params = [{transform_indices = @transform_0, window_bounds = array<i64: 4, 256>}, {pipeline_mode = #tpu.pipeline_mode<synchronous>, transform_indices = @transform_1, window_bounds = array<i64: 256, 128>}, {pipeline_mode = #tpu.pipeline_mode<synchronous>, transform_indices = @transform_2, window_bounds = array<i64: 1, 128>}, {transform_indices = @transform_3, window_bounds = array<i64: 4, 128>}]} {
    %c0 = arith.constant 0 : index
    %c0_0 = arith.constant 0 : index
    %0 = vector.load %arg1[%c0, %c0_0] : memref<4x256xf32, #tpu.memory_space<vmem>>, vector<4x256xf32>
    %c0_1 = arith.constant 0 : index
    %c0_2 = arith.constant 0 : index
    %1 = vector.load %arg2[%c0_1, %c0_2] : memref<256x128xf32, #tpu.memory_space<vmem>>, vector<256x128xf32>
    %cst = arith.constant dense<0.000000e+00> : vector<4x128xf32>
    %2 = tpu.matmul %0, %1, %cst {dimension_numbers = #tpu.dot_dimension_numbers<[1], [0], [0], [1], [0, 0, 1, 1], [], []>} : vector<4x256xf32>, vector<256x128xf32>, vector<4x128xf32> -> vector<4x128xf32>
    %c0_3 = arith.constant 0 : index
    %c0_4 = arith.constant 0 : index
    %3 = vector.load %arg3[%c0_3, %c0_4] : memref<1x128xf32, #tpu.memory_space<vmem>>, vector<1x128xf32>
    %4 = vector.broadcast %3 : vector<1x128xf32> to vector<4x128xf32>
    %5 = arith.addf %2, %4 : vector<4x128xf32>
    %c0_5 = arith.constant 0 : index
    %c0_6 = arith.constant 0 : index
    %6 = vector.load %arg4[%c0_5, %c0_6] : memref<4x128xf32, #tpu.memory_space<vmem>>, vector<4x128xf32>
    tpu.vector_store %arg4[%c0_5, %c0_6], %5 {strides = array<i32>} : memref<4x128xf32, #tpu.memory_space<vmem>>, vector<4x128xf32>,
    return
  }
  func.func @transform_0(%arg0: i32) -> (i32, i32) {
    %c0_i32 = arith.constant 0 : i32
    %c0_i32_0 = arith.constant 0 : i32
    return %arg0, %c0_i32 : i32, i32
  }
  func.func @transform_1(%arg0: i32) -> (i32, i32) {
    %c0_i32 = arith.constant 0 : i32
    %c0_i32_0 = arith.constant 0 : i32
    %c0_i32_1 = arith.constant 0 : i32
    return %c0_i32, %c0_i32_0 : i32, i32
  }
  func.func @transform_2(%arg0: i32) -> (i32, i32) {
    %c0_i32 = arith.constant 0 : i32
    %c0_i32_0 = arith.constant 0 : i32
    %c0_i32_1 = arith.constant 0 : i32
    return %c0_i32, %c0_i32_0 : i32, i32
  }
  func.func @transform_3(%arg0: i32) -> (i32, i32) {
    %c0_i32 = arith.constant 0 : i32
    %c0_i32_0 = arith.constant 0 : i32
    return %arg0, %c0_i32 : i32, i32
  }
}

</mosaic_0001>

<bundles_post_ra>
// kernel: bownn_forward.1
= control target key start
LH: loop header
LB: loop body
LE: loop exit
PB: predicated region body
PF: predicated region fallthrough
CT: control target
= control target key end

     0   :  { %8 = vsyncpa [#allocation3], 0  ;;  %s279_s0 = inlined_call_operand.vmem [shape: f32[4,256], index: 0, kind: input, shape index: {}]   ;;  %s280_s1 = inlined_call_operand.hbm [shape: f32[256,128], index: 1, kind: input, shape index: {}]   ;;  %s281_s2 = inlined_call_operand.vmem [shape: f32[1,128], index: 2, kind: input, shape index: {}]   ;;  %s282_s3 = inlined_call_operand.hbm [shape: f32[4,128], index: 3, kind: output, shape index: {}]  }
   0x1   :  { %9 = vsyncpa [#allocation4], 0  ;;  %s243_s12 = smov [#allocation2]  }
   0x2   :  { %s17_s13 = sshll.u32 %s243_s12, 4  ;;  %s18_s13 = int_to_ptr.vmem [resolvable:$true] %s17_s13 }
   0x3   :  { %s207_s14 = scalar_lea.vmem %s18_s13, 4096  ;;  %p212_p1 = scmp.lt.s32.totalorder %s18_s13, %s18_s13 }
   0x4   :  { %p208_p0 = scmp.ne.s32.totalorder %s18_s13, %s207_s14  ;;  %p213_p2 = scmp.lt.s32.totalorder %s207_s14, %s207_s14 }
   0x6   :  { %p214_p3 = por %p213_p2, %p212_p1 }
   0x8   :  { %p215_p4 = pnand %p214_p3, %p208_p0 }
   0xa   :  { %218 = shalt.err (!%p215_p4)
}
   0xb   :  { %s244_s15 = smov 128   ;;  %s245_s16 = smov 8  }
   0xc   :  { %23 = dma.hbm_to_vmem [thread:$0]  %s280_s1, 4096, %s18_s13, [#allocation3], %s244_s15, %s244_s15, %s245_s16  }
   0xd   :  { %239 = dma.done.wait [#allocation3], 4096  }
   0xe   :  { %240 = vsyncadd [#allocation3], 4294963200  ;;  %v61_v0 = vld [vmem:[#allocation2 + $0xf8] sm:$0xff]  ;;  %v60_v2 = vld [vmem:[#allocation2 + $0xf0] sm:$0xff]  ;;  %s246_s21 = smov [#allocation5]  }
   0xf   :  { %v45_v1 = vld [vmem:[#allocation2 + $0x78] sm:$0xff]  ;;  %159 = vmatprep.subr.mxu0 %v61_v0  ;;  %v44_v3 = vld [vmem:[#allocation2 + $0x70] sm:$0xff]  ;;  %v59_v4 = vld [vmem:[#allocation2 + $0xe8] sm:$0xff]  ;;  %s149_s22 = sshll.u32 %s246_s21, 4  ;;  %s150_s22 = int_to_ptr.vmem [resolvable:$true] %s149_s22 }
  0x10   :  { %160 = vmatpush3.msra.mxu0 %v45_v1  ;;  %v43_v5 = vld [vmem:[#allocation2 + $0x68] sm:$0xff]  ;;  %v58_v6 = vld [vmem:[#allocation2 + $0xe0] sm:$0xff]  ;;  %v57_v8 = vld [vmem:[#allocation2 + $0xd8] sm:$0xff]  ;;  %s219_s23 = scalar_lea.vmem %s150_s22, 64  ;;  %p224_p6 = scmp.lt.s32.totalorder %s150_s22, %s150_s22 }
  0x11   :  { %161 = vmatprep.subr.mxu0 %v60_v2  ;;  %v42_v7 = vld [vmem:[#allocation2 + $0x60] sm:$0xff]  ;;  %v41_v9 = vld [vmem:[#allocation2 + $0x58] sm:$0xff]  ;;  %v56_v10 = vld [vmem:[#allocation2 + $0xd0] sm:$0xff]  ;;  %p220_p5 = scmp.ne.s32.totalorder %s150_s22, %s219_s23  ;;  %p225_p7 = scmp.lt.s32.totalorder %s219_s23, %s219_s23 }
  0x12   :  { %162 = vmatpush3.msra.mxu0 %v44_v3  ;;  %v40_v11 = vld [vmem:[#allocation2 + $0x50] sm:$0xff]  ;;  %v55_v12 = vld [vmem:[#allocation2 + $0xc8] sm:$0xff]  ;;  %v29_v13 = vld [vmem:[%s279_s0] sm:$0xff] }
  0x13   :  { %163 = vmatprep.subr.mxu0 %v59_v4  ;;  %v39_v14 = vld [vmem:[#allocation2 + $0x48] sm:$0xff]  ;;  %v70_v15 = vcombine.high %v29_v13, %v29_v13  ;;  %v54_v16 = vld [vmem:[#allocation2 + $0xc0] sm:$0xff]  ;;  %v53_v18 = vld [vmem:[#allocation2 + $0xb8] sm:$0xff]  ;;  %p226_p8 = por %p225_p7, %p224_p6 }
  0x14   :  { %164 = vmatpush3.msra.mxu0 %v43_v5  ;;  %v38_v17 = vld [vmem:[#allocation2 + $0x40] sm:$0xff]  ;;  %v37_v19 = vld [vmem:[#allocation2 + $0x38] sm:$0xff]  ;;  %v52_v20 = vld [vmem:[#allocation2 + $0xb0] sm:$0xff] }
  0x15   :  { %165 = vmatprep.subr.mxu0 %v58_v6  ;;  %136 = vmatprep.mubr.f32.mxu0 %v70_v15  ;;  %v36_v21 = vld [vmem:[#allocation2 + $0x30] sm:$0xff]  ;;  %v51_v22 = vld [vmem:[#allocation2 + $0xa8] sm:$0xff]  ;;  %v50_v24 = vld [vmem:[#allocation2 + $0xa0] sm:$0xff]  ;;  %p227_p9 = pnand %p226_p8, %p220_p5 }
  0x16   :  { %166 = vmatpush3.msra.mxu0 %v42_v7  ;;  %v35_v23 = vld [vmem:[#allocation2 + $0x28] sm:$0xff]  ;;  %v34_v25 = vld [vmem:[#allocation2 + $0x20] sm:$0xff]  ;;  %v49_v26 = vld [vmem:[#allocation2 + $0x98] sm:$0xff] }
  0x17   :  { %167 = vmatprep.subr.mxu0 %v57_v8  ;;  %v33_v27 = vld [vmem:[#allocation2 + $0x18] sm:$0xff]  ;;  %v48_v28 = vld [vmem:[#allocation2 + $0x90] sm:$0xff]  ;;  %v47_v30 = vld [vmem:[#allocation2 + $0x88] sm:$0xff] }
  0x18   :  { %168 = vmatpush3.msra.mxu0 %v41_v9  ;;  %v32_v29 = vld [vmem:[#allocation2 + $0x10] sm:$0xff]  ;;  %v31_v31 = vld [vmem:[#allocation2 + $0x8] sm:$0xff]  ;;  %v46_v32 = vld [vmem:[#allocation2 + $0x80] sm:$0xff] }
  0x19   :  { %169 = vmatprep.subr.mxu0 %v56_v10  ;;  %v30_v33 = vld [vmem:[#allocation2] sm:$0xff] }
  0x1a   :  { %170 = vmatpush3.msra.mxu0 %v40_v11  ;;  %v158_v35 = vld [vmem:[%s281_s2] ss:$0 sm:$0xff] }
  0x1b   :  { %171 = vmatprep.subr.mxu0 %v55_v12 }
  0x1c   :  { %172 = vmatpush3.msra.mxu0 %v39_v14 }
  0x1d   :  { %173 = vmatprep.subr.mxu0 %v54_v16 }
  0x1e   :  { %174 = vmatpush3.msra.mxu0 %v38_v17 }
  0x1f   :  { %175 = vmatprep.subr.mxu0 %v53_v18 }
  0x20   :  { %176 = vmatpush3.msra.mxu0 %v37_v19 }
  0x21   :  { %177 = vmatprep.subr.mxu0 %v52_v20 }
  0x22   :  { %178 = vmatpush3.msra.mxu0 %v36_v21 }
  0x23   :  { %179 = vmatprep.subr.mxu0 %v51_v22 }
  0x24   :  { %180 = vmatpush3.msra.mxu0 %v35_v23 }
  0x25   :  { %181 = vmatprep.subr.mxu0 %v50_v24 }
  0x26   :  { %182 = vmatpush3.msra.mxu0 %v34_v25 }
  0x27   :  { %183 = vmatprep.subr.mxu0 %v49_v26 }
  0x28   :  { %184 = vmatpush3.msra.mxu0 %v33_v27 }
  0x29   :  { %185 = vmatprep.subr.mxu0 %v48_v28 }
  0x2a   :  { %186 = vmatpush3.msra.mxu0 %v32_v29 }
  0x2b   :  { %187 = vmatprep.subr.mxu0 %v47_v30 }
  0x2c   :  { %188 = vmatpush3.msra.mxu0 %v31_v31 }
  0x2d   :  { %189 = vmatprep.subr.mxu0 %v46_v32 }
  0x2e   :  { %190 = vmatpush3.msra.mxu0 %v30_v33 }
  0x2f   :  { %137 = vmatmul.mubr.f32.vlgmr.msra.gmra.mxu0 %v29_v13 }
  0xef   :  { %v191_v34 = vpop.f32.mrf.mxu0 }
  0xf1   :  { %v192_v36 = vpop.f32.mrf.mxu0 }
  0xf2   :  { %v193_v37 = vadd.f32 %v192_v36, %v191_v34 }
  0xf4   :  { %v139_v38 = vadd.f32 %v193_v37, %v158_v35 }
  0xf6   :  { %142 = vst [vmem:[#allocation5] sm:$0xf] %v139_v38 }
  0xf7   :  { %230 = shalt.err (!%p227_p9)
}
  0xf8   :  { %152 = dma.vmem_to_hbm [thread:$0]  %s150_s22, 64, %s282_s3, [#allocation4]  }
  0xf9   :  { %241 = dma.done.wait [#allocation4], 64  }
  0xfa   :  { %242 = vsyncadd [#allocation4], 4294967232 }
  0xfb   :  { %156 = vsyncpa [#allocation3], 1 }
  0xfc   :  { %157 = vsyncpa [#allocation4], 1 }

</bundles_post_ra>
